<compile_context>
chip_gen: v7x
topology: tpu7x:2x2x1
jax: 0.10.0
libtpu: 0.0.40
codegen_flags: <defaults>
</compile_context>

<pallas_src>
import functools

import jax
import jax.numpy as jnp
from jax.experimental import pallas as pl
from jax.experimental.pallas import tpu as pltpu

LANES = 128          # vreg lane width
SUBLANES = 8         # f32 sublanes per vreg
ROW_ALIGN = 16       # small-path row alignment (friendly to 16/32-bit dtypes)
BIG_MIN_ROWS = 1024  # >= 1024 full lane rows -> streaming (no-padding) path
EPS = 1e-7


def _chip_config():
    """Returns (max_f32_block_rows, parallel_splits, vmem_limit_bytes)."""
    kind = ""
    try:
        kind = jax.devices()[0].device_kind.lower()
    except Exception:
        pass
    if "v7" in kind or "7x" in kind:
        # 2 TensorCores/chip, 64 MiB physical VMEM, ~3.2 TB/s HBM.
        return 8192, 2, 48 * 1024 * 1024
    if "v6" in kind:
        # 1 TensorCore, 128 MiB physical VMEM, ~1.4 TB/s HBM.
        return 8192, 1, 64 * 1024 * 1024
    # v5e / older / unknown: stay inside the 16 MiB default scoped VMEM limit.
    return 2048, 1, None


def _round_up(x, m):
    return (x + m - 1) // m * m


def _msle_kernel(p_ref, t_ref, out_ref, *, block_rows, total_rows,
                 inner_steps, num_blocks, log_part, any_partial):
    c = pl.program_id(0)   # parallel split (megacore shard on v7x)
    j = pl.program_id(1)   # sequential reduction steps within the split

    @pl.when(j == 0)
    def _():
        out_ref[...] = jnp.zeros_like(out_ref)

    def accumulate(mask_rows):
        p = p_ref[...].astype(jnp.float32)
        t = t_ref[...].astype(jnp.float32)
        d = p - t
        dl = jnp.log(p + EPS) - jnp.log(t + EPS)
        s = d * d + log_part * (dl * dl)          # fused single accumulator
        if mask_rows:
            # Last real block (possibly ragged) and any clamped duplicate
            # block: zero rows past the real extent.  One select on `s` only;
            # select semantics make garbage/NaN in masked rows harmless.
            g = c * inner_steps + j
            row_ids = g * block_rows + jax.lax.broadcasted_iota(
                jnp.int32, (block_rows, LANES), 0)
            s = jnp.where(row_ids < total_rows, s, 0.0)
        # Fold the (block_rows, 128) tile onto the (8, 128) accumulator:
        # whole-vreg VPU adds only; no cross-lane XLU work in steady state.
        out_ref[...] += s.reshape(block_rows // SUBLANES, SUBLANES, LANES).sum(axis=0)

    if any_partial:
        g = c * inner_steps + j

        @pl.when(g < num_blocks - 1)          # steady state: mask-free
        def _():
            accumulate(mask_rows=False)

        @pl.when(g >= num_blocks - 1)         # edge / duplicate block: masked
        def _():
            accumulate(mask_rows=True)
    else:
        accumulate(mask_rows=False)


def msle_loss(pred, actual, log_part):
    """Pallas equivalent of MSLELoss(log_part)(pred, actual). Returns f32 scalar."""
    assert pred.shape == actual.shape
    n_elems = pred.size

    max_rows, num_splits, vmem_limit = _chip_config()
    if jnp.dtype(pred.dtype).itemsize <= 2:
        max_rows *= 2                      # same bytes/step for 16-bit inputs

    flat_p = pred.reshape(-1)              # native dtype: no wrapper upcast
    flat_t = actual.reshape(-1)

    tail_sum = jnp.float32(0.0)
    aligned = (n_elems // LANES) * LANES
    rows_full = aligned // LANES

    if rows_full >= BIG_MIN_ROWS:
        # Streaming path: no padding copies.  Ragged (<128 elem) tail is summed
        # in plain JAX; the kernel masks the ragged last *block* in-kernel.
        rem = n_elems - aligned
        if rem:
            tp = flat_p[aligned:].astype(jnp.float32)
            tt = flat_t[aligned:].astype(jnp.float32)
            td = tp - tt
            tdl = jnp.log(tp + EPS) - jnp.log(tt + EPS)
            tail_sum = jnp.sum(td * td + log_part * (tdl * tdl))
            flat_p = flat_p[:aligned]
            flat_t = flat_t[:aligned]
        rows = rows_full
        # Balance block size across blocks (and across splits on v7x) so the
        # last block is never a nearly-empty full-size tile.
        target_blocks = max(pl.cdiv(rows, max_rows), num_splits)
        block_rows = min(max_rows, _round_up(pl.cdiv(rows, target_blocks), SUBLANES))
    else:
        # Small input: pad to one aligned block (cheap at this size).
        pad_to = _round_up(max(n_elems, SUBLANES * LANES), ROW_ALIGN * LANES)
        pad = pad_to - n_elems
        if pad:
            # Identical fill in both operands -> exactly zero loss contribution.
            flat_p = jnp.concatenate([flat_p, jnp.ones((pad,), flat_p.dtype)])
            flat_t = jnp.concatenate([flat_t, jnp.ones((pad,), flat_t.dtype)])
        rows = pad_to // LANES
        block_rows = rows

    p2 = flat_p.reshape(rows, LANES)
    t2 = flat_t.reshape(rows, LANES)

    num_blocks = pl.cdiv(rows, block_rows)
    splits = min(num_splits, num_blocks)
    inner = pl.cdiv(num_blocks, splits)
    any_partial = (rows % block_rows != 0) or (splits * inner != num_blocks)

    def in_map(c, j):
        # Clamp so the DMA never targets a fully out-of-range block; the gated
        # in-kernel row mask zeroes any duplicated / partial contribution.
        return (jnp.minimum(c * inner + j, num_blocks - 1), 0)

    kernel = functools.partial(
        _msle_kernel,
        block_rows=block_rows,
        total_rows=rows,
        inner_steps=inner,
        num_blocks=num_blocks,
        log_part=float(log_part),
        any_partial=any_partial,
    )

    partials = pl.pallas_call(
        kernel,
        out_shape=jax.ShapeDtypeStruct((splits, SUBLANES, LANES), jnp.float32),
        grid_spec=pltpu.PrefetchScalarGridSpec(
            num_scalar_prefetch=0,
            grid=(splits, inner),
            in_specs=[
                pl.BlockSpec((block_rows, LANES), in_map),
                pl.BlockSpec((block_rows, LANES), in_map),
            ],
            out_specs=pl.BlockSpec((None, SUBLANES, LANES), lambda c, j: (c, 0, 0)),
        ),
        compiler_params=pltpu.CompilerParams(
            dimension_semantics=("parallel", "arbitrary"),
            vmem_limit_bytes=vmem_limit),
    )(p2, t2)

    # Tiny cross-lane combine + the single 1/n scale.
    return (jnp.sum(partials) + tail_sum) / n_elems


def _msle_ref(pred, actual, log_part):
    p = pred.astype(jnp.float32)
    a = actual.astype(jnp.float32)
    mse = jnp.mean((p - a) ** 2)
    mse_log = jnp.mean((jnp.log(p + EPS) - jnp.log(a + EPS)) ** 2)
    return mse + log_part * mse_log


if __name__ == "__main__":
    log_part = 0.5  # self.a
    key = jax.random.PRNGKey(0)

    cases = [
        ((2, 4, 16, 16), jnp.float32),      # exact lane fit, single block (primary)
        ((2, 4, 16, 16), jnp.bfloat16),     # native 16-bit input path
        ((2, 4, 18, 18), jnp.float32),      # small ragged -> padded single block
        ((4, 13, 112, 112), jnp.float32),   # streaming path, masked edge block
        ((3, 5, 211, 211), jnp.float32),    # streaming path + ragged <128 JAX tail
    ]

    for shape, dtype in cases:
        key, k1, k2 = jax.random.split(key, 3)
        # Strictly positive values so log() is well defined (matches the
        # module's intended use on non-negative predictions / targets).
        pred = jax.random.uniform(k1, shape, jnp.float32,
                                  minval=0.1, maxval=2.0).astype(dtype)
        actual = jax.random.uniform(k2, shape, jnp.float32,
                                    minval=0.1, maxval=2.0).astype(dtype)

        loss = jax.block_until_ready(msle_loss(pred, actual, log_part))
        ref = _msle_ref(pred, actual, log_part)

        assert jnp.isfinite(loss), (shape, dtype, loss)
        assert jnp.allclose(loss, ref, rtol=2e-4, atol=1e-6), (shape, dtype, loss, ref)

    print("KERNEL_OK")
</pallas_src>

<mosaic_0001>
module attributes {stable_mosaic.version = 11 : i64} {
  func.func @_msle_kernel(%arg0: i32, %arg1: i32, %arg2: memref<16x128xf32, #tpu.memory_space<vmem>>, %arg3: memref<16x128xf32, #tpu.memory_space<vmem>>, %arg4: memref<1x8x128xf32, #tpu.memory_space<vmem>>) attributes {dimension_semantics = [#tpu.dimension_semantics<parallel>, #tpu.dimension_semantics<arbitrary>], iteration_bounds = array<i64: 1, 1>, scalar_prefetch = 0 : i64, scratch_operands = 0 : i64, tpu.core_type = #tpu.core_type<tc>, window_params = [{transform_indices = @transform_0, window_bounds = array<i64: 16, 128>}, {transform_indices = @transform_1, window_bounds = array<i64: 16, 128>}, {transform_indices = @transform_2, window_bounds = array<i64: 1, 8, 128>}]} {
    %c0_i32 = arith.constant 0 : i32
    %0 = arith.cmpi eq, %arg1, %c0_i32 : i32
    %1 = arith.extui %0 : i1 to i32
    %c0_i32_0 = arith.constant 0 : i32
    %2 = arith.cmpi ne, %1, %c0_i32_0 : i32
    scf.if %2 {
      %cst_13 = arith.constant 0.000000e+00 : f32
      %26 = vector.broadcast %cst_13 : f32 to vector<8x128xf32>
      %c0_14 = arith.constant 0 : index
      %c0_15 = arith.constant 0 : index
      %c0_16 = arith.constant 0 : index
      %27 = vector.load %arg4[%c0_14, %c0_15, %c0_16] : memref<1x8x128xf32, #tpu.memory_space<vmem>>, vector<1x8x128xf32>
      %28 = vector.shape_cast %27 : vector<1x8x128xf32> to vector<8x128xf32>
      %29 = vector.shape_cast %26 : vector<8x128xf32> to vector<1x8x128xf32>
      tpu.vector_store %arg4[%c0_14, %c0_15, %c0_16], %29 {strides = array<i32>} : memref<1x8x128xf32, #tpu.memory_space<vmem>>, vector<1x8x128xf32>,
    } else {
    }
    %c0 = arith.constant 0 : index
    %c0_1 = arith.constant 0 : index
    %3 = vector.load %arg2[%c0, %c0_1] : memref<16x128xf32, #tpu.memory_space<vmem>>, vector<16x128xf32>
    %c0_2 = arith.constant 0 : index
    %c0_3 = arith.constant 0 : index
    %4 = vector.load %arg3[%c0_2, %c0_3] : memref<16x128xf32, #tpu.memory_space<vmem>>, vector<16x128xf32>
    %5 = arith.subf %3, %4 : vector<16x128xf32>
    %cst = arith.constant 1.000000e-07 : f32
    %6 = vector.broadcast %cst : f32 to vector<16x128xf32>
    %7 = arith.addf %3, %6 : vector<16x128xf32>
    %8 = math.log %7 : vector<16x128xf32>
    %cst_4 = arith.constant 1.000000e-07 : f32
    %9 = vector.broadcast %cst_4 : f32 to vector<16x128xf32>
    %10 = arith.addf %4, %9 : vector<16x128xf32>
    %11 = math.log %10 : vector<16x128xf32>
    %12 = arith.subf %8, %11 : vector<16x128xf32>
    %13 = arith.mulf %5, %5 : vector<16x128xf32>
    %14 = arith.mulf %12, %12 : vector<16x128xf32>
    %cst_5 = arith.constant 5.000000e-01 : f32
    %15 = vector.broadcast %cst_5 : f32 to vector<16x128xf32>
    %16 = arith.mulf %15, %14 : vector<16x128xf32>
    %17 = arith.addf %13, %16 : vector<16x128xf32>
    %c0_6 = arith.constant 0 : index
    %c0_7 = arith.constant 0 : index
    %c0_8 = arith.constant 0 : index
    %18 = vector.load %arg4[%c0_6, %c0_7, %c0_8] : memref<1x8x128xf32, #tpu.memory_space<vmem>>, vector<1x8x128xf32>
    %19 = vector.shape_cast %18 : vector<1x8x128xf32> to vector<8x128xf32>
    %20 = vector.shape_cast %17 : vector<16x128xf32> to vector<2x8x128xf32>
    %cst_9 = arith.constant dense<0.000000e+00> : vector<8x128xf32>
    %21 = vector.multi_reduction <add>, %20, %cst_9 [0] : vector<2x8x128xf32> to vector<8x128xf32>
    %22 = arith.addf %19, %21 : vector<8x128xf32>
    %c0_10 = arith.constant 0 : index
    %c0_11 = arith.constant 0 : index
    %c0_12 = arith.constant 0 : index
    %23 = vector.load %arg4[%c0_10, %c0_11, %c0_12] : memref<1x8x128xf32, #tpu.memory_space<vmem>>, vector<1x8x128xf32>
    %24 = vector.shape_cast %23 : vector<1x8x128xf32> to vector<8x128xf32>
    %25 = vector.shape_cast %22 : vector<8x128xf32> to vector<1x8x128xf32>
    tpu.vector_store %arg4[%c0_10, %c0_11, %c0_12], %25 {strides = array<i32>} : memref<1x8x128xf32, #tpu.memory_space<vmem>>, vector<1x8x128xf32>,
    return
  }
  func.func @transform_0(%arg0: i32, %arg1: i32) -> (i32, i32) {
    %c1_i32 = arith.constant 1 : i32
    %0 = arith.muli %arg0, %c1_i32 : i32
    %1 = arith.addi %0, %arg1 : i32
    %c0_i32 = arith.constant 0 : i32
    %2 = arith.minsi %1, %c0_i32 : i32
    %c0_i32_0 = arith.constant 0 : i32
    %c0_i32_1 = arith.constant 0 : i32
    return %2, %c0_i32_0 : i32, i32
  }
  func.func @transform_1(%arg0: i32, %arg1: i32) -> (i32, i32) {
    %c1_i32 = arith.constant 1 : i32
    %0 = arith.muli %arg0, %c1_i32 : i32
    %1 = arith.addi %0, %arg1 : i32
    %c0_i32 = arith.constant 0 : i32
    %2 = arith.minsi %1, %c0_i32 : i32
    %c0_i32_0 = arith.constant 0 : i32
    %c0_i32_1 = arith.constant 0 : i32
    return %2, %c0_i32_0 : i32, i32
  }
  func.func @transform_2(%arg0: i32, %arg1: i32) -> (i32, i32, i32) {
    %c0_i32 = arith.constant 0 : i32
    %c0_i32_0 = arith.constant 0 : i32
    %c0_i32_1 = arith.constant 0 : i32
    return %arg0, %c0_i32, %c0_i32_0 : i32, i32, i32
  }
}

</mosaic_0001>

<bundles_post_ra>
// kernel: tpu_custom_call.1
= control target key start
LH: loop header
LB: loop body
LE: loop exit
PB: predicated region body
PF: predicated region fallthrough
CT: control target
= control target key end

     0   :  { %7 = vsyncpa [#allocation3], 0  ;;  %s259_s0 = inlined_call_operand.hbm [shape: f32[16,128], index: 0, kind: input, shape index: {}]   ;;  %s260_s1 = inlined_call_operand.hbm [shape: f32[16,128], index: 1, kind: input, shape index: {}]   ;;  %s261_s2 = inlined_call_operand.hbm [shape: f32[1,8,128], index: 2, kind: output, shape index: {}]  }
   0x1   :  { %8 = vsyncpa [#allocation6], 0 }
   0x2   :  { %9 = vsyncpa [#allocation4], 0  ;;  %s203_s9 = smov [#allocation2]   ;;  %s131_s13 = scalar_lea.hbm %s259_s0, 256 }
   0x3   :  { %s21_s10 = sshll.u32 %s203_s9, 4  ;;  %p132_p0 = scmp.ne.s32.totalorder %s259_s0, %s131_s13  ;;  %s22_s10 = int_to_ptr.vmem [resolvable:$true] %s21_s10 }
   0x4   :  { %p135_p1 = scmp.lt.u32.totalorder %s131_s13, %s259_s0 }
   0x6   :  { %p137_p2 = pnand %p135_p1, %p132_p0 }
   0x8   :  { %140 = shalt.err (!%p137_p2)
}
   0x9   :  { %s141_s18 = scalar_lea.vmem %s22_s10, 256  ;;  %p146_p4 = scmp.lt.s32.totalorder %s22_s10, %s22_s10 }
   0xa   :  { %p142_p3 = scmp.ne.s32.totalorder %s22_s10, %s141_s18  ;;  %p147_p5 = scmp.lt.s32.totalorder %s141_s18, %s141_s18 }
   0xc   :  { %p148_p6 = por %p147_p5, %p146_p4 }
   0xe   :  { %p149_p7 = pnand %p148_p6, %p142_p3 }
  0x10   :  { %152 = shalt.err (!%p149_p7)
}
  0x11   :  { %s204_s19 = smov 128   ;;  %s205_s20 = smov 8  }
  0x12   :  { %27 = dma.hbm_to_vmem [thread:$0]  %s259_s0, 256, %s22_s10, [#allocation3], %s204_s19, %s204_s19, %s205_s20  }
  0x13   :  { %s206_s23 = smov [#allocation5]   ;;  %s153_s27 = scalar_lea.hbm %s260_s1, 256 }
  0x14   :  { %s39_s24 = sshll.u32 %s206_s23, 4  ;;  %p154_p8 = scmp.ne.s32.totalorder %s260_s1, %s153_s27  ;;  %s40_s24 = int_to_ptr.vmem [resolvable:$true] %s39_s24 }
  0x15   :  { %p157_p9 = scmp.lt.u32.totalorder %s153_s27, %s260_s1 }
  0x17   :  { %p159_p10 = pnand %p157_p9, %p154_p8 }
  0x19   :  { %162 = shalt.err (!%p159_p10)
}
  0x1a   :  { %s163_s4 = scalar_lea.vmem %s40_s24, 256  ;;  %p168_p12 = scmp.lt.s32.totalorder %s40_s24, %s40_s24 }
  0x1b   :  { %p164_p11 = scmp.ne.s32.totalorder %s40_s24, %s163_s4  ;;  %p169_p13 = scmp.lt.s32.totalorder %s163_s4, %s163_s4 }
  0x1d   :  { %p170_p0 = por %p169_p13, %p168_p12 }
  0x1f   :  { %p171_p1 = pnand %p170_p0, %p164_p11 }
  0x21   :  { %174 = shalt.err (!%p171_p1)
}
  0x22   :  { %45 = dma.hbm_to_vmem [thread:$0]  %s260_s1, 256, %s40_s24, [#allocation6], %s204_s19, %s204_s19, %s205_s20  }
  0x23   :  { %197 = dma.done.wait [#allocation3], 256  }
  0x24   :  { %198 = vsyncadd [#allocation3], 4294967040 }
  0x25   :  { %199 = dma.done.wait [#allocation6], 256  }
  0x26   :  { %200 = vsyncadd [#allocation6], 4294967040  ;;  %v65_v0 = vld [vmem:[#allocation2] sm:$0xff]  ;;  %v66_v1 = vld [vmem:[#allocation2 + $0x8] sm:$0xff]  ;;  %s207_s1 = smov [#allocation7]  }
  0x27   :  { %v67_v2 = vld [vmem:[#allocation5] sm:$0xff]  ;;  %v68_v3 = vld [vmem:[#allocation5 + $0x8] sm:$0xff]  ;;  %v71_v4 = vadd.f32 1e-07, %v65_v0  ;;  %v72_v5 = vadd.f32 1e-07, %v66_v1 }
  0x28   :  { %v77_v6 = vadd.f32 1e-07, %v67_v2  ;;  %v78_v7 = vadd.f32 1e-07, %v68_v3  ;;  %v69_v14 = vsub.f32 %v65_v0, %v67_v2  ;;  %v70_v16 = vsub.f32 %v66_v1, %v68_v3  ;;  %s103_s6 = sshll.u32 %s207_s1, 4  ;;  %s104_s6 = int_to_ptr.vmem [resolvable:$true] %s103_s6 }
  0x29   :  { %123 = vlog2.f32 %v71_v4  ;;  %s175_s7 = scalar_lea.vmem %s104_s6, 128  ;;  %p180_p3 = scmp.lt.s32.totalorder %s104_s6, %s104_s6 }
  0x2a   :  { %125 = vlog2.f32 %v72_v5  ;;  %v85_v20 = vmul.f32 %v69_v14, %v69_v14  ;;  %v86_v22 = vmul.f32 %v70_v16, %v70_v16  ;;  %p176_p2 = scmp.ne.s32.totalorder %s104_s6, %s175_s7  ;;  %p181_p4 = scmp.lt.s32.totalorder %s175_s7, %s175_s7 }
  0x2b   :  { %127 = vlog2.f32 %v77_v6 }
  0x2c   :  { %129 = vlog2.f32 %v78_v7  ;;  %p182_p5 = por %p181_p4, %p180_p3 }
  0x2e   :  { %p183_p6 = pnand %p182_p5, %p176_p2 }
  0x33   :  { %v124_v8 = vpop.eup %123 }
  0x34   :  { %v126_v9 = vpop.eup %125  ;;  %v74_v10 = vmul.f32 0.6931472, %v124_v8 }
  0x35   :  { %v128_v11 = vpop.eup %127  ;;  %v76_v12 = vmul.f32 0.6931472, %v126_v9 }
  0x36   :  { %v130_v13 = vpop.eup %129  ;;  %v80_v15 = vmul.f32 0.6931472, %v128_v11 }
  0x37   :  { %v82_v17 = vmul.f32 0.6931472, %v130_v13 }
  0x38   :  { %v83_v18 = vsub.f32 %v74_v10, %v80_v15 }
  0x39   :  { %v84_v19 = vsub.f32 %v76_v12, %v82_v17 }
  0x3a   :  { %v87_v21 = vmul.f32 %v83_v18, %v83_v18 }
  0x3b   :  { %v88_v23 = vmul.f32 %v84_v19, %v84_v19 }
  0x3c   :  { %v89_v24 = vmul.f32 0.5, %v87_v21 }
  0x3d   :  { %v90_v25 = vmul.f32 0.5, %v88_v23 }
  0x3e   :  { %v91_v26 = vadd.f32 %v89_v24, %v85_v20 }
  0x3f   :  { %v92_v27 = vadd.f32 %v90_v25, %v86_v22 }
  0x41   :  { %v94_v28 = vadd.f32 %v92_v27, %v91_v26 }
  0x43   :  { %96 = vst [vmem:[#allocation7] sm:$0xff] %v94_v28 }
  0x44   :  { %186 = shalt.err (!%p183_p6)
}
  0x45   :  { %s187_s10 = scalar_lea.hbm %s261_s2, 128 }
  0x46   :  { %p188_p7 = scmp.ne.s32.totalorder %s261_s2, %s187_s10  ;;  %p191_p8 = scmp.lt.u32.totalorder %s187_s10, %s261_s2 }
  0x48   :  { %p193_p9 = pnand %p191_p8, %p188_p7 }
  0x4a   :  { %196 = shalt.err (!%p193_p9)
}
  0x4b   :  { %106 = dma.vmem_to_hbm [thread:$0]  %s104_s6, 128, %s261_s2, [#allocation4]  }
  0x4c   :  { %201 = dma.done.wait [#allocation4], 128  }
  0x4d   :  { %202 = vsyncadd [#allocation4], 4294967168 }
  0x4e   :  { %110 = vsyncpa [#allocation3], 1 }
  0x4f   :  { %111 = vsyncpa [#allocation6], 1 }
  0x50   :  { %112 = vsyncpa [#allocation4], 1 }

</bundles_post_ra>
